<compile_context>
chip_gen: v7x
topology: tpu7x:2x2x1
jax: 0.10.0
libtpu: 0.0.40
codegen_flags: <defaults>
</compile_context>

<pallas_src>
import functools
import math

import jax
import jax.numpy as jnp
from jax.experimental import pallas as pl
from jax.experimental.pallas import tpu as pltpu

_LANE = 128      # lane width: output-feature padding target
_SUBLANE = 8     # sublane width: batch-tile divisibility


def _round_up(x, m):
    return ((x + m - 1) // m) * m


def _choose_batch_tile(batch, target=512):
    """Sublane-aligned batch tile.

    Large batches: ~target-sized tiles (512-1024 hits ~85% of HBM roofline vs ~63%
    at 256).  Medium batches: split into >= 2 programs so both v7x TensorCores get
    work under dimension_semantics=("parallel",).  Tiny batches: one block.
    """
    if batch <= 2 * _SUBLANE:
        return _round_up(batch, _SUBLANE)
    half = _round_up((batch + 1) // 2, _SUBLANE)
    return int(min(target, half))


def _fused_mlp_kernel(x_ref, *refs, num_layers: int):
    """refs = (w0, b0, w1, b1, ..., w_{L-1}, b_{L-1}, o_ref).

    All params are bf16 and lane-padded; activations stay in vregs/VMEM (bf16 between
    layers, f32 accumulator inside each layer).
    """
    o_ref = refs[-1]
    wb = refs[:-1]
    h = x_ref[...]                                   # bf16 (TB, fin)
    for layer in range(num_layers):                  # static unroll: full LLO visibility
        w = wb[2 * layer][...]                       # bf16 (fin, fout_pad)
        b = wb[2 * layer + 1][...]                   # bf16 (1, fout_pad)
        acc = jnp.dot(h, w, preferred_element_type=jnp.float32)   # MXU, f32 acc
        acc = acc + b.astype(jnp.float32)
        if layer < num_layers - 1:                   # all but the output layer get ReLU
            acc = jnp.maximum(acc, 0.0)
            h = acc.astype(jnp.bfloat16)             # bf16 operand for the next MXU pass
        else:
            o_ref[...] = acc.astype(o_ref.dtype)     # lane-dense f32 logits


def fused_mlp(x, params_padded, *, target_batch_tile=512):
    """Run the whole MLP in one pallas_call, tiled over batch (no wrapper pads)."""
    batch, fin = x.shape
    num_layers = len(params_padded)
    fout_pad = params_padded[-1][0].shape[1]

    batch_tile = _choose_batch_tile(batch, target_batch_tile)
    grid = (pl.cdiv(batch, batch_tile),)             # trailing partial block is masked

    x_bf16 = x.astype(jnp.bfloat16)                  # halve x HBM traffic

    in_specs = [pl.BlockSpec((batch_tile, fin), lambda i: (i, 0))]
    flat_args = [x_bf16]
    for w, b in params_padded:
        # Full-array blocks with a constant index_map: VMEM-resident across the batch
        # grid, fetched once (no per-tile re-DMA).
        # TODO(synk): on v7x, pipeline_mode=pl.Buffered(1) here would halve the
        # resident-weight footprint (invariant blocks don't need double-buffering).
        in_specs.append(pl.BlockSpec(w.shape, lambda i: (0, 0)))
        in_specs.append(pl.BlockSpec(b.shape, lambda i: (0, 0)))
        flat_args.append(w)
        flat_args.append(b)
    out_spec = pl.BlockSpec((batch_tile, fout_pad), lambda i: (i, 0))

    # VMEM budget: double-buffered activation tiles + resident bf16 params (+ slack).
    # Clamp to 60 MiB so the same request is valid on v7x (64 MiB physical) and raises
    # the too-small default scoped limits on v5e (16 MiB) / v6e (32 MiB) when needed.
    param_bytes = sum(w.size * w.dtype.itemsize + b.size * b.dtype.itemsize
                      for w, b in params_padded)
    tile_bytes = batch_tile * fin * 2 + batch_tile * fout_pad * 4
    est = 2 * (tile_bytes + param_bytes)
    vmem_limit = int(min(max(2 * est + (8 << 20), 32 << 20), 60 << 20))

    kernel = functools.partial(_fused_mlp_kernel, num_layers=num_layers)
    return pl.pallas_call(
        kernel,
        out_shape=jax.ShapeDtypeStruct((batch, fout_pad), jnp.float32),
        grid_spec=pl.GridSpec(grid=grid, in_specs=in_specs, out_specs=out_spec),
        compiler_params=pltpu.CompilerParams(
            dimension_semantics=("parallel",),       # shard batch grid across v7x TCs
            vmem_limit_bytes=vmem_limit,
        ),
    )(*flat_args)


def init_params(key, input_size, num_classes, num_hidden_layers, hidden_size):
    """PyTorch-style uniform init.

    Returns (unpadded f32 params, bf16 padded params).  Padded weights are
    (prev_padded_fin, round_up(fout, 128)) with zero fill; the FIRST layer keeps its
    true fan-in so raw x needs no feature padding.  Zero rows/cols are exact through
    bias + ReLU and chained matmuls.
    """
    dims = [input_size] + [hidden_size] * num_hidden_layers + [num_classes]
    params_f32, params_padded = [], []
    prev_pad = input_size
    for fin, fout in zip(dims[:-1], dims[1:]):
        key, kw, kb = jax.random.split(key, 3)
        bound = 1.0 / math.sqrt(fin)
        w = jax.random.uniform(kw, (fin, fout), jnp.float32, -bound, bound)
        b = jax.random.uniform(kb, (fout,), jnp.float32, -bound, bound)
        params_f32.append((w, b))

        fout_p = _round_up(fout, _LANE)
        w_p = jnp.zeros((prev_pad, fout_p), jnp.bfloat16).at[:fin, :fout].set(
            w.astype(jnp.bfloat16))
        b_p = jnp.zeros((1, fout_p), jnp.bfloat16).at[0, :fout].set(
            b.astype(jnp.bfloat16))
        params_padded.append((w_p, b_p))
        prev_pad = fout_p
    return params_f32, params_padded


def simple_classifier_forward(x, params_padded, num_classes):
    """Matches SimpleClassifier.forward (dropout_prob is unused in the PyTorch module)."""
    out_pad = fused_mlp(x, params_padded)
    return out_pad[:, :num_classes]


if __name__ == "__main__":
    # Small shapes consistent with the module: tabular features -> classes.
    batch = 8
    input_size = 16
    hidden_size = 32
    num_hidden_layers = 3
    num_classes = 4

    key = jax.random.PRNGKey(0)
    kx, kp = jax.random.split(key)
    x = jax.random.normal(kx, (batch, input_size), jnp.float32)
    params_f32, params_padded = init_params(
        kp, input_size, num_classes, num_hidden_layers, hidden_size
    )

    out = simple_classifier_forward(x, params_padded, num_classes)
    out = jax.block_until_ready(out)

    # Pure-JAX reference mirroring the kernel's dtype strategy
    # (bf16 operands, f32 accumulation) with unpadded params.
    num_layers = len(params_f32)
    h = x.astype(jnp.bfloat16)
    ref = None
    for l, (w, b) in enumerate(params_f32):
        a = jnp.dot(h, w.astype(jnp.bfloat16), preferred_element_type=jnp.float32)
        a = a + b.astype(jnp.bfloat16).astype(jnp.float32)
        if l < num_layers - 1:
            h = jnp.maximum(a, 0.0).astype(jnp.bfloat16)
        else:
            ref = a

    assert out.shape == (batch, num_classes)
    max_err = float(jnp.max(jnp.abs(out - ref)))
    assert jnp.allclose(out, ref, atol=5e-3, rtol=5e-3), max_err

    print("KERNEL_OK")
</pallas_src>

<mosaic_0001>
module attributes {stable_mosaic.version = 11 : i64} {
  func.func @_fused_mlp_kernel(%arg0: i32, %arg1: memref<8x16xbf16, #tpu.memory_space<vmem>>, %arg2: memref<16x128xbf16, #tpu.memory_space<vmem>>, %arg3: memref<1x128xbf16, #tpu.memory_space<vmem>>, %arg4: memref<128x128xbf16, #tpu.memory_space<vmem>>, %arg5: memref<1x128xbf16, #tpu.memory_space<vmem>>, %arg6: memref<128x128xbf16, #tpu.memory_space<vmem>>, %arg7: memref<1x128xbf16, #tpu.memory_space<vmem>>, %arg8: memref<128x128xbf16, #tpu.memory_space<vmem>>, %arg9: memref<1x128xbf16, #tpu.memory_space<vmem>>, %arg10: memref<8x128xf32, #tpu.memory_space<vmem>>) attributes {dimension_semantics = [#tpu.dimension_semantics<parallel>], iteration_bounds = array<i64: 1>, scalar_prefetch = 0 : i64, scratch_operands = 0 : i64, tpu.core_type = #tpu.core_type<tc>, window_params = [{transform_indices = @transform_0, window_bounds = array<i64: 8, 16>}, {pipeline_mode = #tpu.pipeline_mode<synchronous>, transform_indices = @transform_1, window_bounds = array<i64: 16, 128>}, {pipeline_mode = #tpu.pipeline_mode<synchronous>, transform_indices = @transform_2, window_bounds = array<i64: 1, 128>}, {pipeline_mode = #tpu.pipeline_mode<synchronous>, transform_indices = @transform_3, window_bounds = array<i64: 128, 128>}, {pipeline_mode = #tpu.pipeline_mode<synchronous>, transform_indices = @transform_4, window_bounds = array<i64: 1, 128>}, {pipeline_mode = #tpu.pipeline_mode<synchronous>, transform_indices = @transform_5, window_bounds = array<i64: 128, 128>}, {pipeline_mode = #tpu.pipeline_mode<synchronous>, transform_indices = @transform_6, window_bounds = array<i64: 1, 128>}, {pipeline_mode = #tpu.pipeline_mode<synchronous>, transform_indices = @transform_7, window_bounds = array<i64: 128, 128>}, {pipeline_mode = #tpu.pipeline_mode<synchronous>, transform_indices = @transform_8, window_bounds = array<i64: 1, 128>}, {transform_indices = @transform_9, window_bounds = array<i64: 8, 128>}]} {
    %c0 = arith.constant 0 : index
    %c0_0 = arith.constant 0 : index
    %0 = vector.load %arg1[%c0, %c0_0] : memref<8x16xbf16, #tpu.memory_space<vmem>>, vector<8x16xbf16>
    %c0_1 = arith.constant 0 : index
    %c0_2 = arith.constant 0 : index
    %1 = vector.load %arg2[%c0_1, %c0_2] : memref<16x128xbf16, #tpu.memory_space<vmem>>, vector<16x128xbf16>
    %c0_3 = arith.constant 0 : index
    %c0_4 = arith.constant 0 : index
    %2 = vector.load %arg3[%c0_3, %c0_4] : memref<1x128xbf16, #tpu.memory_space<vmem>>, vector<1x128xbf16>
    %cst = arith.constant dense<0.000000e+00> : vector<8x128xf32>
    %3 = tpu.matmul %0, %1, %cst {dimension_numbers = #tpu.dot_dimension_numbers<[1], [0], [0], [1], [0, 0, 1, 1], [], []>} : vector<8x16xbf16>, vector<16x128xbf16>, vector<8x128xf32> -> vector<8x128xf32>
    %4 = arith.extf %2 : vector<1x128xbf16> to vector<1x128xf32>
    %5 = vector.broadcast %4 : vector<1x128xf32> to vector<8x128xf32>
    %6 = arith.addf %3, %5 : vector<8x128xf32>
    %cst_5 = arith.constant 0.000000e+00 : f32
    %7 = vector.broadcast %cst_5 : f32 to vector<8x128xf32>
    %8 = arith.maximumf %6, %7 : vector<8x128xf32>
    %9 = arith.truncf %8 : vector<8x128xf32> to vector<8x128xbf16>
    %c0_6 = arith.constant 0 : index
    %c0_7 = arith.constant 0 : index
    %10 = vector.load %arg4[%c0_6, %c0_7] : memref<128x128xbf16, #tpu.memory_space<vmem>>, vector<128x128xbf16>
    %c0_8 = arith.constant 0 : index
    %c0_9 = arith.constant 0 : index
    %11 = vector.load %arg5[%c0_8, %c0_9] : memref<1x128xbf16, #tpu.memory_space<vmem>>, vector<1x128xbf16>
    %cst_10 = arith.constant dense<0.000000e+00> : vector<8x128xf32>
    %12 = tpu.matmul %9, %10, %cst_10 {dimension_numbers = #tpu.dot_dimension_numbers<[1], [0], [0], [1], [0, 0, 1, 1], [], []>} : vector<8x128xbf16>, vector<128x128xbf16>, vector<8x128xf32> -> vector<8x128xf32>
    %13 = arith.extf %11 : vector<1x128xbf16> to vector<1x128xf32>
    %14 = vector.broadcast %13 : vector<1x128xf32> to vector<8x128xf32>
    %15 = arith.addf %12, %14 : vector<8x128xf32>
    %cst_11 = arith.constant 0.000000e+00 : f32
    %16 = vector.broadcast %cst_11 : f32 to vector<8x128xf32>
    %17 = arith.maximumf %15, %16 : vector<8x128xf32>
    %18 = arith.truncf %17 : vector<8x128xf32> to vector<8x128xbf16>
    %c0_12 = arith.constant 0 : index
    %c0_13 = arith.constant 0 : index
    %19 = vector.load %arg6[%c0_12, %c0_13] : memref<128x128xbf16, #tpu.memory_space<vmem>>, vector<128x128xbf16>
    %c0_14 = arith.constant 0 : index
    %c0_15 = arith.constant 0 : index
    %20 = vector.load %arg7[%c0_14, %c0_15] : memref<1x128xbf16, #tpu.memory_space<vmem>>, vector<1x128xbf16>
    %cst_16 = arith.constant dense<0.000000e+00> : vector<8x128xf32>
    %21 = tpu.matmul %18, %19, %cst_16 {dimension_numbers = #tpu.dot_dimension_numbers<[1], [0], [0], [1], [0, 0, 1, 1], [], []>} : vector<8x128xbf16>, vector<128x128xbf16>, vector<8x128xf32> -> vector<8x128xf32>
    %22 = arith.extf %20 : vector<1x128xbf16> to vector<1x128xf32>
    %23 = vector.broadcast %22 : vector<1x128xf32> to vector<8x128xf32>
    %24 = arith.addf %21, %23 : vector<8x128xf32>
    %cst_17 = arith.constant 0.000000e+00 : f32
    %25 = vector.broadcast %cst_17 : f32 to vector<8x128xf32>
    %26 = arith.maximumf %24, %25 : vector<8x128xf32>
    %27 = arith.truncf %26 : vector<8x128xf32> to vector<8x128xbf16>
    %c0_18 = arith.constant 0 : index
    %c0_19 = arith.constant 0 : index
    %28 = vector.load %arg8[%c0_18, %c0_19] : memref<128x128xbf16, #tpu.memory_space<vmem>>, vector<128x128xbf16>
    %c0_20 = arith.constant 0 : index
    %c0_21 = arith.constant 0 : index
    %29 = vector.load %arg9[%c0_20, %c0_21] : memref<1x128xbf16, #tpu.memory_space<vmem>>, vector<1x128xbf16>
    %cst_22 = arith.constant dense<0.000000e+00> : vector<8x128xf32>
    %30 = tpu.matmul %27, %28, %cst_22 {dimension_numbers = #tpu.dot_dimension_numbers<[1], [0], [0], [1], [0, 0, 1, 1], [], []>} : vector<8x128xbf16>, vector<128x128xbf16>, vector<8x128xf32> -> vector<8x128xf32>
    %31 = arith.extf %29 : vector<1x128xbf16> to vector<1x128xf32>
    %32 = vector.broadcast %31 : vector<1x128xf32> to vector<8x128xf32>
    %33 = arith.addf %30, %32 : vector<8x128xf32>
    %c0_23 = arith.constant 0 : index
    %c0_24 = arith.constant 0 : index
    %34 = vector.load %arg10[%c0_23, %c0_24] : memref<8x128xf32, #tpu.memory_space<vmem>>, vector<8x128xf32>
    tpu.vector_store %arg10[%c0_23, %c0_24], %33 {strides = array<i32>} : memref<8x128xf32, #tpu.memory_space<vmem>>, vector<8x128xf32>,
    return
  }
  func.func @transform_0(%arg0: i32) -> (i32, i32) {
    %c0_i32 = arith.constant 0 : i32
    %c0_i32_0 = arith.constant 0 : i32
    return %arg0, %c0_i32 : i32, i32
  }
  func.func @transform_1(%arg0: i32) -> (i32, i32) {
    %c0_i32 = arith.constant 0 : i32
    %c0_i32_0 = arith.constant 0 : i32
    %c0_i32_1 = arith.constant 0 : i32
    return %c0_i32, %c0_i32_0 : i32, i32
  }
  func.func @transform_2(%arg0: i32) -> (i32, i32) {
    %c0_i32 = arith.constant 0 : i32
    %c0_i32_0 = arith.constant 0 : i32
    %c0_i32_1 = arith.constant 0 : i32
    return %c0_i32, %c0_i32_0 : i32, i32
  }
  func.func @transform_3(%arg0: i32) -> (i32, i32) {
    %c0_i32 = arith.constant 0 : i32
    %c0_i32_0 = arith.constant 0 : i32
    %c0_i32_1 = arith.constant 0 : i32
    return %c0_i32, %c0_i32_0 : i32, i32
  }
  func.func @transform_4(%arg0: i32) -> (i32, i32) {
    %c0_i32 = arith.constant 0 : i32
    %c0_i32_0 = arith.constant 0 : i32
    %c0_i32_1 = arith.constant 0 : i32
    return %c0_i32, %c0_i32_0 : i32, i32
  }
  func.func @transform_5(%arg0: i32) -> (i32, i32) {
    %c0_i32 = arith.constant 0 : i32
    %c0_i32_0 = arith.constant 0 : i32
    %c0_i32_1 = arith.constant 0 : i32
    return %c0_i32, %c0_i32_0 : i32, i32
  }
  func.func @transform_6(%arg0: i32) -> (i32, i32) {
    %c0_i32 = arith.constant 0 : i32
    %c0_i32_0 = arith.constant 0 : i32
    %c0_i32_1 = arith.constant 0 : i32
    return %c0_i32, %c0_i32_0 : i32, i32
  }
  func.func @transform_7(%arg0: i32) -> (i32, i32) {
    %c0_i32 = arith.constant 0 : i32
    %c0_i32_0 = arith.constant 0 : i32
    %c0_i32_1 = arith.constant 0 : i32
    return %c0_i32, %c0_i32_0 : i32, i32
  }
  func.func @transform_8(%arg0: i32) -> (i32, i32) {
    %c0_i32 = arith.constant 0 : i32
    %c0_i32_0 = arith.constant 0 : i32
    %c0_i32_1 = arith.constant 0 : i32
    return %c0_i32, %c0_i32_0 : i32, i32
  }
  func.func @transform_9(%arg0: i32) -> (i32, i32) {
    %c0_i32 = arith.constant 0 : i32
    %c0_i32_0 = arith.constant 0 : i32
    return %arg0, %c0_i32 : i32, i32
  }
}

</mosaic_0001>

<bundles_post_ra>
// kernel: tpu_custom_call.1
= control target key start
LH: loop header
LB: loop body
LE: loop exit
PB: predicated region body
PF: predicated region fallthrough
CT: control target
= control target key end

     0   :  { %14 = vsyncpa [#allocation3], 0  ;;  %s1004_s0 = inlined_call_operand.hbm [shape: bf16[8,16], index: 0, kind: input, shape index: {}]   ;;  %s1005_s1 = inlined_call_operand.hbm [shape: bf16[16,128], index: 1, kind: input, shape index: {}]   ;;  %s1006_s2 = inlined_call_operand.vmem [shape: bf16[1,128], index: 2, kind: input, shape index: {}]   ;;  %s1007_s3 = inlined_call_operand.hbm [shape: bf16[128,128], index: 3, kind: input, shape index: {}]   ;;  %s1008_s4 = inlined_call_operand.vmem [shape: bf16[1,128], index: 4, kind: input, shape index: {}]   ;;  %s1009_s5 = inlined_call_operand.hbm [shape: bf16[128,128], index: 5, kind: input, shape index: {}]   ;;  %s1010_s6 = inlined_call_operand.vmem [shape: bf16[1,128], index: 6, kind: input, shape index: {}]   ;;  %s1011_s7 = inlined_call_operand.hbm [shape: bf16[128,128], index: 7, kind: input, shape index: {}]   ;;  %s1012_s8 = inlined_call_operand.vmem [shape: bf16[1,128], index: 8, kind: input, shape index: {}]   ;;  %s1013_s9 = inlined_call_operand.hbm [shape: f32[8,128], index: 9, kind: output, shape index: {}]  }
   0x1   :  { %15 = vsyncpa [#allocation6], 0 }
   0x2   :  { %16 = vsyncpa [#allocation9], 0 }
   0x3   :  { %17 = vsyncpa [#allocation4], 0  ;;  %s809_s30 = smov [#allocation5]   ;;  %s669_s13 = scalar_lea.hbm %s1005_s1, 128 }
   0x4   :  { %s33_s10 = sshll.u32 %s809_s30, 4  ;;  %p670_p0 = scmp.ne.s32.totalorder %s1005_s1, %s669_s13  ;;  %s34_s10 = int_to_ptr.vmem [resolvable:$true] %s33_s10 }
   0x5   :  { %p673_p1 = scmp.lt.u32.totalorder %s669_s13, %s1005_s1 }
   0x7   :  { %p675_p2 = pnand %p673_p1, %p670_p0 }
   0x9   :  { %678 = shalt.err (!%p675_p2)
}
   0xa   :  { %s679_s18 = scalar_lea.vmem %s34_s10, 128  ;;  %p684_p4 = scmp.lt.s32.totalorder %s34_s10, %s34_s10 }
   0xb   :  { %p680_p3 = scmp.ne.s32.totalorder %s34_s10, %s679_s18  ;;  %p685_p5 = scmp.lt.s32.totalorder %s679_s18, %s679_s18 }
   0xd   :  { %p686_p6 = por %p685_p5, %p684_p4 }
   0xf   :  { %p687_p7 = pnand %p686_p6, %p680_p3 }
  0x11   :  { %690 = shalt.err (!%p687_p7)
}
  0x12   :  { %s810_s19 = smov 64   ;;  %s811_s20 = smov 4  }
  0x13   :  { %39 = dma.hbm_to_vmem [thread:$0]  %s1005_s1, 128, %s34_s10, [#allocation6], %s810_s19, %s810_s19, %s811_s20  }
  0x14   :  { %s812_s23 = smov [#allocation8]   ;;  %s813_s25 = smov [#allocation2]  }
  0x15   :  { %s61_s24 = sshll.u32 %s812_s23, 4  ;;  %s24_s26 = sshll.u32 %s813_s25, 4  ;;  %s62_s24 = int_to_ptr.vmem [resolvable:$true] %s61_s24  ;;  %s25_s26 = int_to_ptr.vmem [resolvable:$true] %s24_s26 }
  0x16   :  { %s691_s29 = scalar_lea.hbm %s1009_s5, 1024 }
  0x17   :  { %p692_p8 = scmp.ne.s32.totalorder %s1009_s5, %s691_s29  ;;  %p695_p9 = scmp.lt.u32.totalorder %s691_s29, %s1009_s5 }
  0x19   :  { %p697_p10 = pnand %p695_p9, %p692_p8 }
  0x1b   :  { %700 = shalt.err (!%p697_p10)
}
  0x1c   :  { %s701_s1 = scalar_lea.vmem %s62_s24, 1024  ;;  %p706_p12 = scmp.lt.s32.totalorder %s62_s24, %s62_s24 }
  0x1d   :  { %p702_p11 = scmp.ne.s32.totalorder %s62_s24, %s701_s1  ;;  %p707_p13 = scmp.lt.s32.totalorder %s701_s1, %s701_s1 }
  0x1f   :  { %p708_p0 = por %p707_p13, %p706_p12 }
  0x21   :  { %p709_p1 = pnand %p708_p0, %p702_p11 }
  0x23   :  { %712 = shalt.err (!%p709_p1)
}
  0x24   :  { %67 = dma.hbm_to_vmem [thread:$0]  %s1009_s5, 1024, %s62_s24, [#allocation9], %s810_s19, %s810_s19, %s811_s20  }
  0x25   :  { %s713_s17 = scalar_lea.hbm %s1004_s0, 64 }
  0x26   :  { %p714_p2 = scmp.ne.s32.totalorder %s1004_s0, %s713_s17  ;;  %p717_p3 = scmp.lt.u32.totalorder %s713_s17, %s1004_s0 }
  0x28   :  { %p719_p4 = pnand %p717_p3, %p714_p2 }
  0x2a   :  { %722 = shalt.err (!%p719_p4)
}
  0x2b   :  { %s723_s25 = scalar_lea.vmem %s25_s26, 64  ;;  %p728_p6 = scmp.lt.s32.totalorder %s25_s26, %s25_s26 }
  0x2c   :  { %p724_p5 = scmp.ne.s32.totalorder %s25_s26, %s723_s25  ;;  %p729_p7 = scmp.lt.s32.totalorder %s723_s25, %s723_s25 }
  0x2e   :  { %p730_p8 = por %p729_p7, %p728_p6 }
  0x30   :  { %p731_p9 = pnand %p730_p8, %p724_p5 }
  0x32   :  { %734 = shalt.err (!%p731_p9)
}
  0x33   :  { %27 = dma.hbm_to_vmem [thread:$0]  %s1004_s0, 64, %s25_s26, [#allocation3]  }
  0x34   :  { %s814_s27 = smov [#allocation7]   ;;  %s815_s29 = smov [#allocation10]  }
  0x35   :  { %s47_s28 = sshll.u32 %s814_s27, 4  ;;  %s75_s30 = sshll.u32 %s815_s29, 4  ;;  %s48_s28 = int_to_ptr.vmem [resolvable:$true] %s47_s28  ;;  %s76_s30 = int_to_ptr.vmem [resolvable:$true] %s75_s30 }
  0x36   :  { %s735_s13 = scalar_lea.hbm %s1007_s3, 1024 }
  0x37   :  { %p736_p10 = scmp.ne.s32.totalorder %s1007_s3, %s735_s13  ;;  %p739_p11 = scmp.lt.u32.totalorder %s735_s13, %s1007_s3 }
  0x39   :  { %p741_p12 = pnand %p739_p11, %p736_p10 }
  0x3b   :  { %744 = shalt.err (!%p741_p12)
}
  0x3c   :  { %s745_s0 = scalar_lea.vmem %s48_s28, 1024  ;;  %p750_p0 = scmp.lt.s32.totalorder %s48_s28, %s48_s28 }
  0x3d   :  { %p746_p13 = scmp.ne.s32.totalorder %s48_s28, %s745_s0  ;;  %p751_p1 = scmp.lt.s32.totalorder %s745_s0, %s745_s0 }
  0x3f   :  { %p752_p2 = por %p751_p1, %p750_p0 }
  0x41   :  { %p753_p3 = pnand %p752_p2, %p746_p13 }
  0x43   :  { %756 = shalt.err (!%p753_p3)
}
  0x44   :  { %53 = dma.hbm_to_vmem [thread:$0]  %s1007_s3, 1024, %s48_s28, [#allocation6], %s810_s19, %s810_s19, %s811_s20  }
  0x45   :  { %s757_s21 = scalar_lea.hbm %s1011_s7, 1024 }
  0x46   :  { %p758_p4 = scmp.ne.s32.totalorder %s1011_s7, %s757_s21  ;;  %p761_p5 = scmp.lt.u32.totalorder %s757_s21, %s1011_s7 }
  0x48   :  { %p763_p6 = pnand %p761_p5, %p758_p4 }
  0x4a   :  { %766 = shalt.err (!%p763_p6)
}
  0x4b   :  { %s767_s24 = scalar_lea.vmem %s76_s30, 1024  ;;  %p772_p8 = scmp.lt.s32.totalorder %s76_s30, %s76_s30 }
  0x4c   :  { %p768_p7 = scmp.ne.s32.totalorder %s76_s30, %s767_s24  ;;  %p773_p9 = scmp.lt.s32.totalorder %s767_s24, %s767_s24 }
  0x4e   :  { %p774_p10 = por %p773_p9, %p772_p8 }
  0x50   :  { %p775_p11 = pnand %p774_p10, %p768_p7 }
  0x52   :  { %778 = shalt.err (!%p775_p11)
}
  0x53   :  { %81 = dma.hbm_to_vmem [thread:$0]  %s1011_s7, 1024, %s76_s30, [#allocation9], %s810_s19, %s810_s19, %s811_s20  }
  0x54   :  { %801 = dma.done.wait [#allocation3], 64  }
  0x55   :  { %802 = vsyncadd [#allocation3], 4294967232 }
  0x56   :  { %803 = dma.done.wait [#allocation6], 1152  }
  0x57   :  { %804 = vsyncadd [#allocation6], 4294966144 }
  0x58   :  { %805 = dma.done.wait [#allocation9], 2048  }
  0x59   :  { %806 = vsyncadd [#allocation9], 4294965248  ;;  %v816_v0 = vmov 0.0   ;;  %vm817_vm0 = vmmov 0   ;;  %v644_v1 = vld [vmem:[#allocation5] sm:$0xff]   ;;  %vm115_vm1 = vcmask 130048   ;;  %v105_v17 = vlaneseq }
  0x5a   :  { %568 = vmatprep.subr.bf16.mxu0 %v816_v0  ;;  %570 = vmatprep.mubr.msk.bf16.mxu0 %vm817_vm0, %v816_v0  ;;  %v100_v2 = vld [vmem:[#allocation2] sm:$0xf]  ;;  %v645_v3 = vld [vmem:[#allocation7] sm:$0xff]   ;;  %v646_v4 = vld [vmem:[#allocation7 + $0x8] sm:$0xff]   ;;  %s818_s11 = smov [#allocation11]  }
  0x5b   :  { %574 = vmatprep.subr.bf16.mxu1 %v816_v0  ;;  %590 = vmatprep.mubr.msk.bf16.mxu1 %vm817_vm0, %v816_v0  ;;  %v647_v5 = vld [vmem:[#allocation7 + $0x10] sm:$0xff]   ;;  %v648_v6 = vld [vmem:[#allocation7 + $0x18] sm:$0xff]   ;;  %v649_v7 = vld [vmem:[#allocation7 + $0x20] sm:$0xff]   ;;  %v106_v18 = vshrl.u32 %v105_v17, 7 }
  0x5c   :  { %569 = vmatpush3.bf16.msra.mxu0 %v644_v1  ;;  %575 = vmatpush3.bf16.msra.mxu1 %v645_v3  ;;  %v650_v8 = vld [vmem:[#allocation7 + $0x28] sm:$0xff]   ;;  %v651_v9 = vld [vmem:[#allocation7 + $0x30] sm:$0xff]   ;;  %v652_v10 = vld [vmem:[#allocation7 + $0x38] sm:$0xff]  }
  0x5d   :  { %594 = vmatprep.subr.bf16.mxu0 %v816_v0  ;;  %576 = vmatprep.subr.bf16.mxu1 %v816_v0  ;;  %v653_v11 = vld [vmem:[#allocation8] sm:$0xff]   ;;  %v654_v12 = vld [vmem:[#allocation8 + $0x8] sm:$0xff]   ;;  %v655_v13 = vld [vmem:[#allocation8 + $0x10] sm:$0xff]   ;;  %v967_v21 = vsub.s32 0, %v106_v18 }
  0x5e   :  { %v656_v14 = vld [vmem:[#allocation8 + $0x18] sm:$0xff]   ;;  %v657_v15 = vld [vmem:[#allocation8 + $0x20] sm:$0xff]   ;;  %v658_v16 = vld [vmem:[#allocation8 + $0x28] sm:$0xff]  }
  0x5f   :  { %571 = vmatmul.mubr.msk.bf16.vlgmr.msra.gmra.mrb[0].mxu0 %vm115_vm1, %v100_v2  ;;  %v103_v19 = vld [vmem:[%s1006_s2] sm:$0x1]  ;;  %v660_v31 = vld [vmem:[#allocation8 + $0x38] sm:$0xff]   ;;  %v661_v32 = vld [vmem:[#allocation10] sm:$0xff]  }
  0x60   :  { %610 = vmatprep.mubr.msk.bf16.mxu0 %vm817_vm0, %v816_v0  ;;  %577 = vmatpush3.bf16.msra.mxu1 %v646_v4  ;;  %v104_v20 = vunpack.c.l.bf16 %v103_v19  ;;  %v659_v30 = vld [vmem:[#allocation8 + $0x30] sm:$0xff]   ;;  %v662_v33 = vld [vmem:[#allocation10 + $0x8] sm:$0xff]   ;;  %v664_v35 = vld [vmem:[#allocation10 + $0x18] sm:$0xff]  }
  0x61   :  { %578 = vmatprep.subr.bf16.mxu1 %v816_v0  ;;  %595 = vmatpush3.bf16.msra.mxu0 %v653_v11  ;;  %v663_v34 = vld [vmem:[#allocation10 + $0x10] sm:$0xff]   ;;  %v665_v36 = vld [vmem:[#allocation10 + $0x20] sm:$0xff]   ;;  %v666_v37 = vld [vmem:[#allocation10 + $0x28] sm:$0xff]  }
  0x62   :  { %596 = vmatprep.subr.bf16.mxu0 %v816_v0  ;;  %v108_v22 = vrot.slane %v104_v20, %v967_v21  ;;  %v177_v38 = vld [vmem:[%s1008_s4] sm:$0x1]  ;;  %v668_v49 = vld [vmem:[#allocation10 + $0x38] sm:$0xff]  }
  0x63   :  { %v178_v39 = vunpack.c.l.bf16 %v177_v38  ;;  %v667_v48 = vld [vmem:[#allocation10 + $0x30] sm:$0xff]  }
  0x64   :  { %579 = vmatpush3.bf16.msra.mxu1 %v647_v5  ;;  %v289_v50 = vld [vmem:[%s1010_s6] sm:$0x1]  ;;  %s502_s6 = sshll.u32 %s818_s11, 4  ;;  %s503_s6 = int_to_ptr.vmem [resolvable:$true] %s502_s6 }
  0x65   :  { %580 = vmatprep.subr.bf16.mxu1 %v816_v0  ;;  %597 = vmatpush3.bf16.msra.mxu0 %v654_v12  ;;  %v182_v40 = vrot.slane %v178_v39, %v967_v21  ;;  %v290_v51 = vunpack.c.l.bf16 %v289_v50  ;;  %v401_v60 = vld [vmem:[%s1012_s8] sm:$0x1]  ;;  %s779_s12 = scalar_lea.vmem %s503_s6, 128  ;;  %p784_p13 = scmp.lt.s32.totalorder %s503_s6, %s503_s6 }
  0x66   :  { %598 = vmatprep.subr.bf16.mxu0 %v816_v0  ;;  %v402_v61 = vunpack.c.l.bf16 %v401_v60  ;;  %p780_p12 = scmp.ne.s32.totalorder %s503_s6, %s779_s12  ;;  %p785_p0 = scmp.lt.s32.totalorder %s779_s12, %s779_s12 }
  0x67   :  { %v294_v52 = vrot.slane %v290_v51, %v967_v21 }
  0x68   :  { %581 = vmatpush3.bf16.msra.mxu1 %v648_v6  ;;  %v406_v62 = vrot.slane %v402_v61, %v967_v21  ;;  %p786_p1 = por %p785_p0, %p784_p13 }
  0x69   :  { %582 = vmatprep.subr.bf16.mxu1 %v816_v0  ;;  %599 = vmatpush3.bf16.msra.mxu0 %v655_v13 }
  0x6a   :  { %600 = vmatprep.subr.bf16.mxu0 %v816_v0  ;;  %p787_p2 = pnand %p786_p1, %p780_p12 }
  0x6c   :  { %583 = vmatpush3.bf16.msra.mxu1 %v649_v7 }
  0x6d   :  { %584 = vmatprep.subr.bf16.mxu1 %v816_v0  ;;  %601 = vmatpush3.bf16.msra.mxu0 %v656_v14 }
  0x6e   :  { %602 = vmatprep.subr.bf16.mxu0 %v816_v0 }
  0x70   :  { %585 = vmatpush3.bf16.msra.mxu1 %v650_v8 }
  0x71   :  { %586 = vmatprep.subr.bf16.mxu1 %v816_v0  ;;  %603 = vmatpush3.bf16.msra.mxu0 %v657_v15 }
  0x72   :  { %604 = vmatprep.subr.bf16.mxu0 %v816_v0 }
  0x74   :  { %587 = vmatpush3.bf16.msra.mxu1 %v651_v9 }
  0x75   :  { %588 = vmatprep.subr.bf16.mxu1 %v816_v0  ;;  %605 = vmatpush3.bf16.msra.mxu0 %v658_v16 }
  0x76   :  { %606 = vmatprep.subr.bf16.mxu0 %v816_v0 }
  0x78   :  { %589 = vmatpush3.bf16.msra.mxu1 %v652_v10 }
  0x79   :  { %614 = vmatprep.subr.bf16.mxu1 %v816_v0  ;;  %607 = vmatpush3.bf16.msra.mxu0 %v659_v30 }
  0x7a   :  { %608 = vmatprep.subr.bf16.mxu0 %v816_v0 }
  0x7d   :  { %609 = vmatpush3.bf16.msra.mxu0 %v660_v31 }
 0x132   :  { %v153_v23 = vpop.f32.mrb[0].mxu0 }
 0x133   :  { %v154_v24 = vadd.f32 %v153_v23, %v108_v22  ;;  %v572_v25 = vpop.f32.mrb[1].mxu0 }
 0x134   :  { %v156_v26 = vpop.f32.mrb[2].mxu0 }
 0x135   :  { %v159_v27 = vmax.f32 %v154_v24, 0.0  ;;  %v573_v28 = vpop.f32.mrb[3].mxu0 }
 0x137   :  { %v160_v29 = vpack.c.bf16 %v159_v27, %v159_v27 }
 0x139   :  { %591 = vmatmul.mubr.bf16.vlgmr.msra.gmra.mrb[0].mxu1 %v160_v29 }
 0x13a   :  { %630 = vmatprep.mubr.msk.bf16.mxu1 %vm817_vm0, %v816_v0  ;;  %615 = vmatpush3.bf16.msra.mxu1 %v661_v32 }
 0x13b   :  { %616 = vmatprep.subr.bf16.mxu1 %v816_v0 }
 0x13e   :  { %617 = vmatpush3.bf16.msra.mxu1 %v662_v33 }
 0x13f   :  { %618 = vmatprep.subr.bf16.mxu1 %v816_v0 }
 0x142   :  { %619 = vmatpush3.bf16.msra.mxu1 %v663_v34 }
 0x143   :  { %620 = vmatprep.subr.bf16.mxu1 %v816_v0 }
 0x146   :  { %621 = vmatpush3.bf16.msra.mxu1 %v664_v35 }
 0x147   :  { %622 = vmatprep.subr.bf16.mxu1 %v816_v0 }
 0x14a   :  { %623 = vmatpush3.bf16.msra.mxu1 %v665_v36 }
 0x14b   :  { %624 = vmatprep.subr.bf16.mxu1 %v816_v0 }
 0x14e   :  { %625 = vmatpush3.bf16.msra.mxu1 %v666_v37 }
 0x14f   :  { %626 = vmatprep.subr.bf16.mxu1 %v816_v0 }
 0x152   :  { %627 = vmatpush3.bf16.msra.mxu1 %v667_v48 }
 0x153   :  { %628 = vmatprep.subr.bf16.mxu1 %v816_v0 }
 0x156   :  { %629 = vmatpush3.bf16.msra.mxu1 %v668_v49 }
 0x20c   :  { %v265_v41 = vpop.f32.mrb[0].mxu1 }
 0x20d   :  { %v266_v42 = vadd.f32 %v265_v41, %v182_v40  ;;  %v592_v43 = vpop.f32.mrb[1].mxu1 }
 0x20e   :  { %v268_v44 = vpop.f32.mrb[2].mxu1 }
 0x20f   :  { %v271_v45 = vmax.f32 %v266_v42, 0.0  ;;  %v593_v46 = vpop.f32.mrb[3].mxu1 }
 0x211   :  { %v272_v47 = vpack.c.bf16 %v271_v45, %v271_v45 }
 0x213   :  { %611 = vmatmul.mubr.bf16.vlgmr.msra.gmra.mrb[4].mxu0 %v272_v47 }
 0x2e6   :  { %v377_v53 = vpop.f32.mrb[4].mxu0 }
 0x2e7   :  { %v378_v54 = vadd.f32 %v377_v53, %v294_v52  ;;  %v612_v55 = vpop.f32.mrb[5].mxu0 }
 0x2e8   :  { %v380_v56 = vpop.f32.mrb[6].mxu0 }
 0x2e9   :  { %v383_v57 = vmax.f32 %v378_v54, 0.0  ;;  %v613_v58 = vpop.f32.mrb[7].mxu0 }
 0x2eb   :  { %v384_v59 = vpack.c.bf16 %v383_v57, %v383_v57 }
 0x2ed   :  { %631 = vmatmul.mubr.bf16.vlgmr.msra.gmra.mrb[4].mxu1 %v384_v59 }
 0x3c0   :  { %v489_v63 = vpop.f32.mrb[4].mxu1 }
 0x3c1   :  { %v490_v0 = vadd.f32 %v489_v63, %v406_v62  ;;  %v632_v1 = vpop.f32.mrb[5].mxu1 }
 0x3c2   :  { %v492_v2 = vpop.f32.mrb[6].mxu1 }
 0x3c3   :  { %495 = vst [vmem:[#allocation11] sm:$0xff] %v490_v0  ;;  %v633_v3 = vpop.f32.mrb[7].mxu1 }
 0x3c4   :  { %790 = shalt.err (!%p787_p2)
}
 0x3c5   :  { %s791_s1 = scalar_lea.hbm %s1013_s9, 128 }
 0x3c6   :  { %p792_p3 = scmp.ne.s32.totalorder %s1013_s9, %s791_s1  ;;  %p795_p4 = scmp.lt.u32.totalorder %s791_s1, %s1013_s9 }
 0x3c8   :  { %p797_p5 = pnand %p795_p4, %p792_p3 }
 0x3ca   :  { %800 = shalt.err (!%p797_p5)
}
 0x3cb   :  { %505 = dma.vmem_to_hbm [thread:$0]  %s503_s6, 128, %s1013_s9, [#allocation4]  }
 0x3cc   :  { %807 = dma.done.wait [#allocation4], 128  }
 0x3cd   :  { %808 = vsyncadd [#allocation4], 4294967168 }
 0x3ce   :  { %509 = vsyncpa [#allocation3], 1 }
 0x3cf   :  { %510 = vsyncpa [#allocation6], 1 }
 0x3d0   :  { %511 = vsyncpa [#allocation9], 1 }
 0x3d1   :  { %512 = vsyncpa [#allocation4], 1 }

</bundles_post_ra>
